<compile_context>
chip_gen: v5e
topology: v5e:2x2
jax: 0.10.0
libtpu: 0.0.40
codegen_flags: <defaults>
</compile_context>

<pallas_src>
import jax
import jax.numpy as jnp
from jax.experimental import pallas as pl
from jax.experimental.pallas import tpu as pltpu

IN_DIM = 4
HID_DIM = 10
OUT_DIM = 2

# Offsets into the packed parameter vector (PyTorch [out, in] weight layout).
_W1_OFF = 0                                # w1[j, k] -> _W1_OFF + j * IN_DIM + k
_B1_OFF = _W1_OFF + HID_DIM * IN_DIM       # b1[j]    -> _B1_OFF + j
_W2_OFF = _B1_OFF + HID_DIM                # w2[c, j] -> _W2_OFF + c * HID_DIM + j
_B2_OFF = _W2_OFF + OUT_DIM * HID_DIM      # b2[c]    -> _B2_OFF + c
_N_PARAMS = _B2_OFF + OUT_DIM              # 72


def _pg_appx_kernel(params_ref, xt_ref, out_ref):
    """params_ref: SMEM f32[72]; xt_ref: VMEM [4, B]; out_ref: VMEM [4, B]."""
    xt = xt_ref[...]                                    # [IN_DIM, B], batch on lanes
    B = xt.shape[1]

    # --- fc1 + sigmoid: unrolled scalar-broadcast FMAs on the VPU ------------
    h_rows = []                                         # HID_DIM rows of [1, B]
    for j in range(HID_DIM):
        acc = jnp.full((1, B), params_ref[_B1_OFF + j], dtype=jnp.float32)
        for k in range(IN_DIM):
            acc = acc + params_ref[_W1_OFF + j * IN_DIM + k] * xt[k:k + 1, :]
        # sigmoid(z) = 1 / (1 + exp(-z)); exp and reciprocal both run on the EUP.
        h_rows.append(pl.reciprocal(1.0 + jnp.exp(-acc), approx=True))

    # --- fc2: unrolled scalar-broadcast FMAs ----------------------------------
    logit_rows = []                                     # OUT_DIM rows of [1, B]
    for c in range(OUT_DIM):
        acc = jnp.full((1, B), params_ref[_B2_OFF + c], dtype=jnp.float32)
        for j in range(HID_DIM):
            acc = acc + params_ref[_W2_OFF + c * HID_DIM + j] * h_rows[j]
        logit_rows.append(acc)

    # --- softmax over dim=0 (batch axis == lane axis in this layout) ---------
    soft_rows = []
    for c in range(OUT_DIM):
        row = logit_rows[c]
        m = jnp.max(row, axis=1, keepdims=True)         # [1, 1]
        e = jnp.exp(row - m)                            # [1, B]
        denom = jnp.sum(e, axis=1, keepdims=True)       # [1, 1]
        soft_rows.append(e * pl.reciprocal(denom, approx=True))

    # Lane-dense output slab: rows 0..1 = softmax, rows 2..3 = feature_value.
    for c in range(OUT_DIM):
        out_ref[c:c + 1, :] = soft_rows[c]
        out_ref[OUT_DIM + c:OUT_DIM + c + 1, :] = logit_rows[c]


def pg_appx_nn_forward(x, w1, b1, w2, b2):
    """x: [B, 4]; w1: [10, 4] (PyTorch [out, in]); b1: [10]; w2: [2, 10]; b2: [2].

    Returns (softmax(logits, axis=0), logits), both [B, 2] float32.
    """
    x = jnp.asarray(x, dtype=jnp.float32)
    B = x.shape[0]

    # Pack all parameters into one flat f32[72] vector (single tiny SMEM DMA).
    params = jnp.concatenate([
        jnp.asarray(w1, jnp.float32).reshape(-1),
        jnp.asarray(b1, jnp.float32).reshape(-1),
        jnp.asarray(w2, jnp.float32).reshape(-1),
        jnp.asarray(b2, jnp.float32).reshape(-1),
    ])
    assert params.shape[0] == _N_PARAMS

    xt = x.T                                            # [4, B], batch on lanes

    smem_spec = pl.BlockSpec(memory_space=pltpu.MemorySpace.SMEM)
    vmem_spec = pl.BlockSpec(memory_space=pltpu.MemorySpace.VMEM)

    out = pl.pallas_call(
        _pg_appx_kernel,
        out_shape=jax.ShapeDtypeStruct((2 * OUT_DIM, B), jnp.float32),
        in_specs=[smem_spec, vmem_spec],
        out_specs=vmem_spec,
    )(params, xt)

    soft = out[:OUT_DIM, :].T                           # [B, 2] softmax(dim=0)
    feat = out[OUT_DIM:, :].T                           # [B, 2] raw fc2 logits
    return soft, feat


def init_params(key):
    """Deterministic init mirroring the PyTorch __init__ (weights are [out, in])."""
    k1, k2 = jax.random.split(key)
    w1 = 0.3 * jax.random.normal(k1, (HID_DIM, IN_DIM), dtype=jnp.float32)
    b1 = jnp.full((HID_DIM,), 0.1, dtype=jnp.float32)
    w2 = 0.3 * jax.random.normal(k2, (OUT_DIM, HID_DIM), dtype=jnp.float32)
    b2 = jnp.full((OUT_DIM,), 0.1, dtype=jnp.float32)
    return w1, b1, w2, b2


def _reference(x, w1, b1, w2, b2):
    """Pure-JAX (exact f32) reference of the PyTorch forward."""
    h = jax.nn.sigmoid(x @ w1.T + b1)
    logits = h @ w2.T + b2
    return jax.nn.softmax(logits, axis=0), logits


if __name__ == "__main__":
    key = jax.random.PRNGKey(0)
    kx, kp = jax.random.split(key)

    # Small batch of 4-dim states (CartPole-like observation).
    x = jax.random.normal(kx, (2, IN_DIM), dtype=jnp.float32)
    w1, b1, w2, b2 = init_params(kp)

    fwd = jax.jit(pg_appx_nn_forward)
    soft, feat = fwd(x, w1, b1, w2, b2)
    soft = jax.block_until_ready(soft)
    feat = jax.block_until_ready(feat)

    ref_soft, ref_feat = _reference(x, w1, b1, w2, b2)
    # Tolerance accounts for the EUP approximate reciprocals (sigmoid / softmax).
    assert jnp.allclose(soft, ref_soft, atol=5e-3, rtol=5e-3), "softmax mismatch"
    assert jnp.allclose(feat, ref_feat, atol=5e-3, rtol=5e-3), "feature_value mismatch"

    print("KERNEL_OK")
</pallas_src>

<mosaic_0001>
module attributes {stable_mosaic.version = 11 : i64} {
  func.func @_pg_appx_kernel(%arg0: memref<72xf32, #tpu.memory_space<smem>>, %arg1: memref<4x2xf32, #tpu.memory_space<vmem>>, %arg2: memref<4x2xf32, #tpu.memory_space<vmem>>) attributes {dimension_semantics = [], scalar_prefetch = 0 : i64, scratch_operands = 0 : i64, tpu.core_type = #tpu.core_type<tc>} {
    %c0 = arith.constant 0 : index
    %c0_0 = arith.constant 0 : index
    %0 = vector.load %arg1[%c0, %c0_0] : memref<4x2xf32, #tpu.memory_space<vmem>>, vector<4x2xf32>
    %c40 = arith.constant 40 : index
    %1 = memref.load %arg0[%c40] : memref<72xf32, #tpu.memory_space<smem>>
    %2 = vector.broadcast %1 : f32 to vector<1x2xf32>
    %c0_1 = arith.constant 0 : index
    %3 = memref.load %arg0[%c0_1] : memref<72xf32, #tpu.memory_space<smem>>
    %4 = vector.extract_strided_slice %0 {offsets = [0, 0], sizes = [1, 2], strides = [1, 1]} : vector<4x2xf32> to vector<1x2xf32>
    %5 = vector.broadcast %3 : f32 to vector<1x2xf32>
    %6 = arith.mulf %5, %4 : vector<1x2xf32>
    %7 = arith.addf %2, %6 : vector<1x2xf32>
    %c1 = arith.constant 1 : index
    %8 = memref.load %arg0[%c1] : memref<72xf32, #tpu.memory_space<smem>>
    %9 = vector.extract_strided_slice %0 {offsets = [1, 0], sizes = [1, 2], strides = [1, 1]} : vector<4x2xf32> to vector<1x2xf32>
    %10 = vector.broadcast %8 : f32 to vector<1x2xf32>
    %11 = arith.mulf %10, %9 : vector<1x2xf32>
    %12 = arith.addf %7, %11 : vector<1x2xf32>
    %c2 = arith.constant 2 : index
    %13 = memref.load %arg0[%c2] : memref<72xf32, #tpu.memory_space<smem>>
    %14 = vector.extract_strided_slice %0 {offsets = [2, 0], sizes = [1, 2], strides = [1, 1]} : vector<4x2xf32> to vector<1x2xf32>
    %15 = vector.broadcast %13 : f32 to vector<1x2xf32>
    %16 = arith.mulf %15, %14 : vector<1x2xf32>
    %17 = arith.addf %12, %16 : vector<1x2xf32>
    %c3 = arith.constant 3 : index
    %18 = memref.load %arg0[%c3] : memref<72xf32, #tpu.memory_space<smem>>
    %19 = vector.extract_strided_slice %0 {offsets = [3, 0], sizes = [1, 2], strides = [1, 1]} : vector<4x2xf32> to vector<1x2xf32>
    %20 = vector.broadcast %18 : f32 to vector<1x2xf32>
    %21 = arith.mulf %20, %19 : vector<1x2xf32>
    %22 = arith.addf %17, %21 : vector<1x2xf32>
    %cst = arith.constant 0.000000e+00 : f32
    %23 = vector.broadcast %cst : f32 to vector<1x2xf32>
    %24 = arith.subf %23, %22 : vector<1x2xf32>
    %25 = math.exp %24 : vector<1x2xf32>
    %cst_2 = arith.constant 1.000000e+00 : f32
    %26 = vector.broadcast %cst_2 : f32 to vector<1x2xf32>
    %27 = arith.addf %26, %25 : vector<1x2xf32>
    %28 = tpu.reciprocal %27 {approx = true} : vector<1x2xf32> -> vector<1x2xf32>
    %c41 = arith.constant 41 : index
    %29 = memref.load %arg0[%c41] : memref<72xf32, #tpu.memory_space<smem>>
    %30 = vector.broadcast %29 : f32 to vector<1x2xf32>
    %c4 = arith.constant 4 : index
    %31 = memref.load %arg0[%c4] : memref<72xf32, #tpu.memory_space<smem>>
    %32 = vector.extract_strided_slice %0 {offsets = [0, 0], sizes = [1, 2], strides = [1, 1]} : vector<4x2xf32> to vector<1x2xf32>
    %33 = vector.broadcast %31 : f32 to vector<1x2xf32>
    %34 = arith.mulf %33, %32 : vector<1x2xf32>
    %35 = arith.addf %30, %34 : vector<1x2xf32>
    %c5 = arith.constant 5 : index
    %36 = memref.load %arg0[%c5] : memref<72xf32, #tpu.memory_space<smem>>
    %37 = vector.extract_strided_slice %0 {offsets = [1, 0], sizes = [1, 2], strides = [1, 1]} : vector<4x2xf32> to vector<1x2xf32>
    %38 = vector.broadcast %36 : f32 to vector<1x2xf32>
    %39 = arith.mulf %38, %37 : vector<1x2xf32>
    %40 = arith.addf %35, %39 : vector<1x2xf32>
    %c6 = arith.constant 6 : index
    %41 = memref.load %arg0[%c6] : memref<72xf32, #tpu.memory_space<smem>>
    %42 = vector.extract_strided_slice %0 {offsets = [2, 0], sizes = [1, 2], strides = [1, 1]} : vector<4x2xf32> to vector<1x2xf32>
    %43 = vector.broadcast %41 : f32 to vector<1x2xf32>
    %44 = arith.mulf %43, %42 : vector<1x2xf32>
    %45 = arith.addf %40, %44 : vector<1x2xf32>
    %c7 = arith.constant 7 : index
    %46 = memref.load %arg0[%c7] : memref<72xf32, #tpu.memory_space<smem>>
    %47 = vector.extract_strided_slice %0 {offsets = [3, 0], sizes = [1, 2], strides = [1, 1]} : vector<4x2xf32> to vector<1x2xf32>
    %48 = vector.broadcast %46 : f32 to vector<1x2xf32>
    %49 = arith.mulf %48, %47 : vector<1x2xf32>
    %50 = arith.addf %45, %49 : vector<1x2xf32>
    %cst_3 = arith.constant 0.000000e+00 : f32
    %51 = vector.broadcast %cst_3 : f32 to vector<1x2xf32>
    %52 = arith.subf %51, %50 : vector<1x2xf32>
    %53 = math.exp %52 : vector<1x2xf32>
    %cst_4 = arith.constant 1.000000e+00 : f32
    %54 = vector.broadcast %cst_4 : f32 to vector<1x2xf32>
    %55 = arith.addf %54, %53 : vector<1x2xf32>
    %56 = tpu.reciprocal %55 {approx = true} : vector<1x2xf32> -> vector<1x2xf32>
    %c42 = arith.constant 42 : index
    %57 = memref.load %arg0[%c42] : memref<72xf32, #tpu.memory_space<smem>>
    %58 = vector.broadcast %57 : f32 to vector<1x2xf32>
    %c8 = arith.constant 8 : index
    %59 = memref.load %arg0[%c8] : memref<72xf32, #tpu.memory_space<smem>>
    %60 = vector.extract_strided_slice %0 {offsets = [0, 0], sizes = [1, 2], strides = [1, 1]} : vector<4x2xf32> to vector<1x2xf32>
    %61 = vector.broadcast %59 : f32 to vector<1x2xf32>
    %62 = arith.mulf %61, %60 : vector<1x2xf32>
    %63 = arith.addf %58, %62 : vector<1x2xf32>
    %c9 = arith.constant 9 : index
    %64 = memref.load %arg0[%c9] : memref<72xf32, #tpu.memory_space<smem>>
    %65 = vector.extract_strided_slice %0 {offsets = [1, 0], sizes = [1, 2], strides = [1, 1]} : vector<4x2xf32> to vector<1x2xf32>
    %66 = vector.broadcast %64 : f32 to vector<1x2xf32>
    %67 = arith.mulf %66, %65 : vector<1x2xf32>
    %68 = arith.addf %63, %67 : vector<1x2xf32>
    %c10 = arith.constant 10 : index
    %69 = memref.load %arg0[%c10] : memref<72xf32, #tpu.memory_space<smem>>
    %70 = vector.extract_strided_slice %0 {offsets = [2, 0], sizes = [1, 2], strides = [1, 1]} : vector<4x2xf32> to vector<1x2xf32>
    %71 = vector.broadcast %69 : f32 to vector<1x2xf32>
    %72 = arith.mulf %71, %70 : vector<1x2xf32>
    %73 = arith.addf %68, %72 : vector<1x2xf32>
    %c11 = arith.constant 11 : index
    %74 = memref.load %arg0[%c11] : memref<72xf32, #tpu.memory_space<smem>>
    %75 = vector.extract_strided_slice %0 {offsets = [3, 0], sizes = [1, 2], strides = [1, 1]} : vector<4x2xf32> to vector<1x2xf32>
    %76 = vector.broadcast %74 : f32 to vector<1x2xf32>
    %77 = arith.mulf %76, %75 : vector<1x2xf32>
    %78 = arith.addf %73, %77 : vector<1x2xf32>
    %cst_5 = arith.constant 0.000000e+00 : f32
    %79 = vector.broadcast %cst_5 : f32 to vector<1x2xf32>
    %80 = arith.subf %79, %78 : vector<1x2xf32>
    %81 = math.exp %80 : vector<1x2xf32>
    %cst_6 = arith.constant 1.000000e+00 : f32
    %82 = vector.broadcast %cst_6 : f32 to vector<1x2xf32>
    %83 = arith.addf %82, %81 : vector<1x2xf32>
    %84 = tpu.reciprocal %83 {approx = true} : vector<1x2xf32> -> vector<1x2xf32>
    %c43 = arith.constant 43 : index
    %85 = memref.load %arg0[%c43] : memref<72xf32, #tpu.memory_space<smem>>
    %86 = vector.broadcast %85 : f32 to vector<1x2xf32>
    %c12 = arith.constant 12 : index
    %87 = memref.load %arg0[%c12] : memref<72xf32, #tpu.memory_space<smem>>
    %88 = vector.extract_strided_slice %0 {offsets = [0, 0], sizes = [1, 2], strides = [1, 1]} : vector<4x2xf32> to vector<1x2xf32>
    %89 = vector.broadcast %87 : f32 to vector<1x2xf32>
    %90 = arith.mulf %89, %88 : vector<1x2xf32>
    %91 = arith.addf %86, %90 : vector<1x2xf32>
    %c13 = arith.constant 13 : index
    %92 = memref.load %arg0[%c13] : memref<72xf32, #tpu.memory_space<smem>>
    %93 = vector.extract_strided_slice %0 {offsets = [1, 0], sizes = [1, 2], strides = [1, 1]} : vector<4x2xf32> to vector<1x2xf32>
    %94 = vector.broadcast %92 : f32 to vector<1x2xf32>
    %95 = arith.mulf %94, %93 : vector<1x2xf32>
    %96 = arith.addf %91, %95 : vector<1x2xf32>
    %c14 = arith.constant 14 : index
    %97 = memref.load %arg0[%c14] : memref<72xf32, #tpu.memory_space<smem>>
    %98 = vector.extract_strided_slice %0 {offsets = [2, 0], sizes = [1, 2], strides = [1, 1]} : vector<4x2xf32> to vector<1x2xf32>
    %99 = vector.broadcast %97 : f32 to vector<1x2xf32>
    %100 = arith.mulf %99, %98 : vector<1x2xf32>
    %101 = arith.addf %96, %100 : vector<1x2xf32>
    %c15 = arith.constant 15 : index
    %102 = memref.load %arg0[%c15] : memref<72xf32, #tpu.memory_space<smem>>
    %103 = vector.extract_strided_slice %0 {offsets = [3, 0], sizes = [1, 2], strides = [1, 1]} : vector<4x2xf32> to vector<1x2xf32>
    %104 = vector.broadcast %102 : f32 to vector<1x2xf32>
    %105 = arith.mulf %104, %103 : vector<1x2xf32>
    %106 = arith.addf %101, %105 : vector<1x2xf32>
    %cst_7 = arith.constant 0.000000e+00 : f32
    %107 = vector.broadcast %cst_7 : f32 to vector<1x2xf32>
    %108 = arith.subf %107, %106 : vector<1x2xf32>
    %109 = math.exp %108 : vector<1x2xf32>
    %cst_8 = arith.constant 1.000000e+00 : f32
    %110 = vector.broadcast %cst_8 : f32 to vector<1x2xf32>
    %111 = arith.addf %110, %109 : vector<1x2xf32>
    %112 = tpu.reciprocal %111 {approx = true} : vector<1x2xf32> -> vector<1x2xf32>
    %c44 = arith.constant 44 : index
    %113 = memref.load %arg0[%c44] : memref<72xf32, #tpu.memory_space<smem>>
    %114 = vector.broadcast %113 : f32 to vector<1x2xf32>
    %c16 = arith.constant 16 : index
    %115 = memref.load %arg0[%c16] : memref<72xf32, #tpu.memory_space<smem>>
    %116 = vector.extract_strided_slice %0 {offsets = [0, 0], sizes = [1, 2], strides = [1, 1]} : vector<4x2xf32> to vector<1x2xf32>
    %117 = vector.broadcast %115 : f32 to vector<1x2xf32>
    %118 = arith.mulf %117, %116 : vector<1x2xf32>
    %119 = arith.addf %114, %118 : vector<1x2xf32>
    %c17 = arith.constant 17 : index
    %120 = memref.load %arg0[%c17] : memref<72xf32, #tpu.memory_space<smem>>
    %121 = vector.extract_strided_slice %0 {offsets = [1, 0], sizes = [1, 2], strides = [1, 1]} : vector<4x2xf32> to vector<1x2xf32>
    %122 = vector.broadcast %120 : f32 to vector<1x2xf32>
    %123 = arith.mulf %122, %121 : vector<1x2xf32>
    %124 = arith.addf %119, %123 : vector<1x2xf32>
    %c18 = arith.constant 18 : index
    %125 = memref.load %arg0[%c18] : memref<72xf32, #tpu.memory_space<smem>>
    %126 = vector.extract_strided_slice %0 {offsets = [2, 0], sizes = [1, 2], strides = [1, 1]} : vector<4x2xf32> to vector<1x2xf32>
    %127 = vector.broadcast %125 : f32 to vector<1x2xf32>
    %128 = arith.mulf %127, %126 : vector<1x2xf32>
    %129 = arith.addf %124, %128 : vector<1x2xf32>
    %c19 = arith.constant 19 : index
    %130 = memref.load %arg0[%c19] : memref<72xf32, #tpu.memory_space<smem>>
    %131 = vector.extract_strided_slice %0 {offsets = [3, 0], sizes = [1, 2], strides = [1, 1]} : vector<4x2xf32> to vector<1x2xf32>
    %132 = vector.broadcast %130 : f32 to vector<1x2xf32>
    %133 = arith.mulf %132, %131 : vector<1x2xf32>
    %134 = arith.addf %129, %133 : vector<1x2xf32>
    %cst_9 = arith.constant 0.000000e+00 : f32
    %135 = vector.broadcast %cst_9 : f32 to vector<1x2xf32>
    %136 = arith.subf %135, %134 : vector<1x2xf32>
    %137 = math.exp %136 : vector<1x2xf32>
    %cst_10 = arith.constant 1.000000e+00 : f32
    %138 = vector.broadcast %cst_10 : f32 to vector<1x2xf32>
    %139 = arith.addf %138, %137 : vector<1x2xf32>
    %140 = tpu.reciprocal %139 {approx = true} : vector<1x2xf32> -> vector<1x2xf32>
    %c45 = arith.constant 45 : index
    %141 = memref.load %arg0[%c45] : memref<72xf32, #tpu.memory_space<smem>>
    %142 = vector.broadcast %141 : f32 to vector<1x2xf32>
    %c20 = arith.constant 20 : index
    %143 = memref.load %arg0[%c20] : memref<72xf32, #tpu.memory_space<smem>>
    %144 = vector.extract_strided_slice %0 {offsets = [0, 0], sizes = [1, 2], strides = [1, 1]} : vector<4x2xf32> to vector<1x2xf32>
    %145 = vector.broadcast %143 : f32 to vector<1x2xf32>
    %146 = arith.mulf %145, %144 : vector<1x2xf32>
    %147 = arith.addf %142, %146 : vector<1x2xf32>
    %c21 = arith.constant 21 : index
    %148 = memref.load %arg0[%c21] : memref<72xf32, #tpu.memory_space<smem>>
    %149 = vector.extract_strided_slice %0 {offsets = [1, 0], sizes = [1, 2], strides = [1, 1]} : vector<4x2xf32> to vector<1x2xf32>
    %150 = vector.broadcast %148 : f32 to vector<1x2xf32>
    %151 = arith.mulf %150, %149 : vector<1x2xf32>
    %152 = arith.addf %147, %151 : vector<1x2xf32>
    %c22 = arith.constant 22 : index
    %153 = memref.load %arg0[%c22] : memref<72xf32, #tpu.memory_space<smem>>
    %154 = vector.extract_strided_slice %0 {offsets = [2, 0], sizes = [1, 2], strides = [1, 1]} : vector<4x2xf32> to vector<1x2xf32>
    %155 = vector.broadcast %153 : f32 to vector<1x2xf32>
    %156 = arith.mulf %155, %154 : vector<1x2xf32>
    %157 = arith.addf %152, %156 : vector<1x2xf32>
    %c23 = arith.constant 23 : index
    %158 = memref.load %arg0[%c23] : memref<72xf32, #tpu.memory_space<smem>>
    %159 = vector.extract_strided_slice %0 {offsets = [3, 0], sizes = [1, 2], strides = [1, 1]} : vector<4x2xf32> to vector<1x2xf32>
    %160 = vector.broadcast %158 : f32 to vector<1x2xf32>
    %161 = arith.mulf %160, %159 : vector<1x2xf32>
    %162 = arith.addf %157, %161 : vector<1x2xf32>
    %cst_11 = arith.constant 0.000000e+00 : f32
    %163 = vector.broadcast %cst_11 : f32 to vector<1x2xf32>
    %164 = arith.subf %163, %162 : vector<1x2xf32>
    %165 = math.exp %164 : vector<1x2xf32>
    %cst_12 = arith.constant 1.000000e+00 : f32
    %166 = vector.broadcast %cst_12 : f32 to vector<1x2xf32>
    %167 = arith.addf %166, %165 : vector<1x2xf32>
    %168 = tpu.reciprocal %167 {approx = true} : vector<1x2xf32> -> vector<1x2xf32>
    %c46 = arith.constant 46 : index
    %169 = memref.load %arg0[%c46] : memref<72xf32, #tpu.memory_space<smem>>
    %170 = vector.broadcast %169 : f32 to vector<1x2xf32>
    %c24 = arith.constant 24 : index
    %171 = memref.load %arg0[%c24] : memref<72xf32, #tpu.memory_space<smem>>
    %172 = vector.extract_strided_slice %0 {offsets = [0, 0], sizes = [1, 2], strides = [1, 1]} : vector<4x2xf32> to vector<1x2xf32>
    %173 = vector.broadcast %171 : f32 to vector<1x2xf32>
    %174 = arith.mulf %173, %172 : vector<1x2xf32>
    %175 = arith.addf %170, %174 : vector<1x2xf32>
    %c25 = arith.constant 25 : index
    %176 = memref.load %arg0[%c25] : memref<72xf32, #tpu.memory_space<smem>>
    %177 = vector.extract_strided_slice %0 {offsets = [1, 0], sizes = [1, 2], strides = [1, 1]} : vector<4x2xf32> to vector<1x2xf32>
    %178 = vector.broadcast %176 : f32 to vector<1x2xf32>
    %179 = arith.mulf %178, %177 : vector<1x2xf32>
    %180 = arith.addf %175, %179 : vector<1x2xf32>
    %c26 = arith.constant 26 : index
    %181 = memref.load %arg0[%c26] : memref<72xf32, #tpu.memory_space<smem>>
    %182 = vector.extract_strided_slice %0 {offsets = [2, 0], sizes = [1, 2], strides = [1, 1]} : vector<4x2xf32> to vector<1x2xf32>
    %183 = vector.broadcast %181 : f32 to vector<1x2xf32>
    %184 = arith.mulf %183, %182 : vector<1x2xf32>
    %185 = arith.addf %180, %184 : vector<1x2xf32>
    %c27 = arith.constant 27 : index
    %186 = memref.load %arg0[%c27] : memref<72xf32, #tpu.memory_space<smem>>
    %187 = vector.extract_strided_slice %0 {offsets = [3, 0], sizes = [1, 2], strides = [1, 1]} : vector<4x2xf32> to vector<1x2xf32>
    %188 = vector.broadcast %186 : f32 to vector<1x2xf32>
    %189 = arith.mulf %188, %187 : vector<1x2xf32>
    %190 = arith.addf %185, %189 : vector<1x2xf32>
    %cst_13 = arith.constant 0.000000e+00 : f32
    %191 = vector.broadcast %cst_13 : f32 to vector<1x2xf32>
    %192 = arith.subf %191, %190 : vector<1x2xf32>
    %193 = math.exp %192 : vector<1x2xf32>
    %cst_14 = arith.constant 1.000000e+00 : f32
    %194 = vector.broadcast %cst_14 : f32 to vector<1x2xf32>
    %195 = arith.addf %194, %193 : vector<1x2xf32>
    %196 = tpu.reciprocal %195 {approx = true} : vector<1x2xf32> -> vector<1x2xf32>
    %c47 = arith.constant 47 : index
    %197 = memref.load %arg0[%c47] : memref<72xf32, #tpu.memory_space<smem>>
    %198 = vector.broadcast %197 : f32 to vector<1x2xf32>
    %c28 = arith.constant 28 : index
    %199 = memref.load %arg0[%c28] : memref<72xf32, #tpu.memory_space<smem>>
    %200 = vector.extract_strided_slice %0 {offsets = [0, 0], sizes = [1, 2], strides = [1, 1]} : vector<4x2xf32> to vector<1x2xf32>
    %201 = vector.broadcast %199 : f32 to vector<1x2xf32>
    %202 = arith.mulf %201, %200 : vector<1x2xf32>
    %203 = arith.addf %198, %202 : vector<1x2xf32>
    %c29 = arith.constant 29 : index
    %204 = memref.load %arg0[%c29] : memref<72xf32, #tpu.memory_space<smem>>
    %205 = vector.extract_strided_slice %0 {offsets = [1, 0], sizes = [1, 2], strides = [1, 1]} : vector<4x2xf32> to vector<1x2xf32>
    %206 = vector.broadcast %204 : f32 to vector<1x2xf32>
    %207 = arith.mulf %206, %205 : vector<1x2xf32>
    %208 = arith.addf %203, %207 : vector<1x2xf32>
    %c30 = arith.constant 30 : index
    %209 = memref.load %arg0[%c30] : memref<72xf32, #tpu.memory_space<smem>>
    %210 = vector.extract_strided_slice %0 {offsets = [2, 0], sizes = [1, 2], strides = [1, 1]} : vector<4x2xf32> to vector<1x2xf32>
    %211 = vector.broadcast %209 : f32 to vector<1x2xf32>
    %212 = arith.mulf %211, %210 : vector<1x2xf32>
    %213 = arith.addf %208, %212 : vector<1x2xf32>
    %c31 = arith.constant 31 : index
    %214 = memref.load %arg0[%c31] : memref<72xf32, #tpu.memory_space<smem>>
    %215 = vector.extract_strided_slice %0 {offsets = [3, 0], sizes = [1, 2], strides = [1, 1]} : vector<4x2xf32> to vector<1x2xf32>
    %216 = vector.broadcast %214 : f32 to vector<1x2xf32>
    %217 = arith.mulf %216, %215 : vector<1x2xf32>
    %218 = arith.addf %213, %217 : vector<1x2xf32>
    %cst_15 = arith.constant 0.000000e+00 : f32
    %219 = vector.broadcast %cst_15 : f32 to vector<1x2xf32>
    %220 = arith.subf %219, %218 : vector<1x2xf32>
    %221 = math.exp %220 : vector<1x2xf32>
    %cst_16 = arith.constant 1.000000e+00 : f32
    %222 = vector.broadcast %cst_16 : f32 to vector<1x2xf32>
    %223 = arith.addf %222, %221 : vector<1x2xf32>
    %224 = tpu.reciprocal %223 {approx = true} : vector<1x2xf32> -> vector<1x2xf32>
    %c48 = arith.constant 48 : index
    %225 = memref.load %arg0[%c48] : memref<72xf32, #tpu.memory_space<smem>>
    %226 = vector.broadcast %225 : f32 to vector<1x2xf32>
    %c32 = arith.constant 32 : index
    %227 = memref.load %arg0[%c32] : memref<72xf32, #tpu.memory_space<smem>>
    %228 = vector.extract_strided_slice %0 {offsets = [0, 0], sizes = [1, 2], strides = [1, 1]} : vector<4x2xf32> to vector<1x2xf32>
    %229 = vector.broadcast %227 : f32 to vector<1x2xf32>
    %230 = arith.mulf %229, %228 : vector<1x2xf32>
    %231 = arith.addf %226, %230 : vector<1x2xf32>
    %c33 = arith.constant 33 : index
    %232 = memref.load %arg0[%c33] : memref<72xf32, #tpu.memory_space<smem>>
    %233 = vector.extract_strided_slice %0 {offsets = [1, 0], sizes = [1, 2], strides = [1, 1]} : vector<4x2xf32> to vector<1x2xf32>
    %234 = vector.broadcast %232 : f32 to vector<1x2xf32>
    %235 = arith.mulf %234, %233 : vector<1x2xf32>
    %236 = arith.addf %231, %235 : vector<1x2xf32>
    %c34 = arith.constant 34 : index
    %237 = memref.load %arg0[%c34] : memref<72xf32, #tpu.memory_space<smem>>
    %238 = vector.extract_strided_slice %0 {offsets = [2, 0], sizes = [1, 2], strides = [1, 1]} : vector<4x2xf32> to vector<1x2xf32>
    %239 = vector.broadcast %237 : f32 to vector<1x2xf32>
    %240 = arith.mulf %239, %238 : vector<1x2xf32>
    %241 = arith.addf %236, %240 : vector<1x2xf32>
    %c35 = arith.constant 35 : index
    %242 = memref.load %arg0[%c35] : memref<72xf32, #tpu.memory_space<smem>>
    %243 = vector.extract_strided_slice %0 {offsets = [3, 0], sizes = [1, 2], strides = [1, 1]} : vector<4x2xf32> to vector<1x2xf32>
    %244 = vector.broadcast %242 : f32 to vector<1x2xf32>
    %245 = arith.mulf %244, %243 : vector<1x2xf32>
    %246 = arith.addf %241, %245 : vector<1x2xf32>
    %cst_17 = arith.constant 0.000000e+00 : f32
    %247 = vector.broadcast %cst_17 : f32 to vector<1x2xf32>
    %248 = arith.subf %247, %246 : vector<1x2xf32>
    %249 = math.exp %248 : vector<1x2xf32>
    %cst_18 = arith.constant 1.000000e+00 : f32
    %250 = vector.broadcast %cst_18 : f32 to vector<1x2xf32>
    %251 = arith.addf %250, %249 : vector<1x2xf32>
    %252 = tpu.reciprocal %251 {approx = true} : vector<1x2xf32> -> vector<1x2xf32>
    %c49 = arith.constant 49 : index
    %253 = memref.load %arg0[%c49] : memref<72xf32, #tpu.memory_space<smem>>
    %254 = vector.broadcast %253 : f32 to vector<1x2xf32>
    %c36 = arith.constant 36 : index
    %255 = memref.load %arg0[%c36] : memref<72xf32, #tpu.memory_space<smem>>
    %256 = vector.extract_strided_slice %0 {offsets = [0, 0], sizes = [1, 2], strides = [1, 1]} : vector<4x2xf32> to vector<1x2xf32>
    %257 = vector.broadcast %255 : f32 to vector<1x2xf32>
    %258 = arith.mulf %257, %256 : vector<1x2xf32>
    %259 = arith.addf %254, %258 : vector<1x2xf32>
    %c37 = arith.constant 37 : index
    %260 = memref.load %arg0[%c37] : memref<72xf32, #tpu.memory_space<smem>>
    %261 = vector.extract_strided_slice %0 {offsets = [1, 0], sizes = [1, 2], strides = [1, 1]} : vector<4x2xf32> to vector<1x2xf32>
    %262 = vector.broadcast %260 : f32 to vector<1x2xf32>
    %263 = arith.mulf %262, %261 : vector<1x2xf32>
    %264 = arith.addf %259, %263 : vector<1x2xf32>
    %c38 = arith.constant 38 : index
    %265 = memref.load %arg0[%c38] : memref<72xf32, #tpu.memory_space<smem>>
    %266 = vector.extract_strided_slice %0 {offsets = [2, 0], sizes = [1, 2], strides = [1, 1]} : vector<4x2xf32> to vector<1x2xf32>
    %267 = vector.broadcast %265 : f32 to vector<1x2xf32>
    %268 = arith.mulf %267, %266 : vector<1x2xf32>
    %269 = arith.addf %264, %268 : vector<1x2xf32>
    %c39 = arith.constant 39 : index
    %270 = memref.load %arg0[%c39] : memref<72xf32, #tpu.memory_space<smem>>
    %271 = vector.extract_strided_slice %0 {offsets = [3, 0], sizes = [1, 2], strides = [1, 1]} : vector<4x2xf32> to vector<1x2xf32>
    %272 = vector.broadcast %270 : f32 to vector<1x2xf32>
    %273 = arith.mulf %272, %271 : vector<1x2xf32>
    %274 = arith.addf %269, %273 : vector<1x2xf32>
    %cst_19 = arith.constant 0.000000e+00 : f32
    %275 = vector.broadcast %cst_19 : f32 to vector<1x2xf32>
    %276 = arith.subf %275, %274 : vector<1x2xf32>
    %277 = math.exp %276 : vector<1x2xf32>
    %cst_20 = arith.constant 1.000000e+00 : f32
    %278 = vector.broadcast %cst_20 : f32 to vector<1x2xf32>
    %279 = arith.addf %278, %277 : vector<1x2xf32>
    %280 = tpu.reciprocal %279 {approx = true} : vector<1x2xf32> -> vector<1x2xf32>
    %c70 = arith.constant 70 : index
    %281 = memref.load %arg0[%c70] : memref<72xf32, #tpu.memory_space<smem>>
    %282 = vector.broadcast %281 : f32 to vector<1x2xf32>
    %c50 = arith.constant 50 : index
    %283 = memref.load %arg0[%c50] : memref<72xf32, #tpu.memory_space<smem>>
    %284 = vector.broadcast %283 : f32 to vector<1x2xf32>
    %285 = arith.mulf %284, %28 : vector<1x2xf32>
    %286 = arith.addf %282, %285 : vector<1x2xf32>
    %c51 = arith.constant 51 : index
    %287 = memref.load %arg0[%c51] : memref<72xf32, #tpu.memory_space<smem>>
    %288 = vector.broadcast %287 : f32 to vector<1x2xf32>
    %289 = arith.mulf %288, %56 : vector<1x2xf32>
    %290 = arith.addf %286, %289 : vector<1x2xf32>
    %c52 = arith.constant 52 : index
    %291 = memref.load %arg0[%c52] : memref<72xf32, #tpu.memory_space<smem>>
    %292 = vector.broadcast %291 : f32 to vector<1x2xf32>
    %293 = arith.mulf %292, %84 : vector<1x2xf32>
    %294 = arith.addf %290, %293 : vector<1x2xf32>
    %c53 = arith.constant 53 : index
    %295 = memref.load %arg0[%c53] : memref<72xf32, #tpu.memory_space<smem>>
    %296 = vector.broadcast %295 : f32 to vector<1x2xf32>
    %297 = arith.mulf %296, %112 : vector<1x2xf32>
    %298 = arith.addf %294, %297 : vector<1x2xf32>
    %c54 = arith.constant 54 : index
    %299 = memref.load %arg0[%c54] : memref<72xf32, #tpu.memory_space<smem>>
    %300 = vector.broadcast %299 : f32 to vector<1x2xf32>
    %301 = arith.mulf %300, %140 : vector<1x2xf32>
    %302 = arith.addf %298, %301 : vector<1x2xf32>
    %c55 = arith.constant 55 : index
    %303 = memref.load %arg0[%c55] : memref<72xf32, #tpu.memory_space<smem>>
    %304 = vector.broadcast %303 : f32 to vector<1x2xf32>
    %305 = arith.mulf %304, %168 : vector<1x2xf32>
    %306 = arith.addf %302, %305 : vector<1x2xf32>
    %c56 = arith.constant 56 : index
    %307 = memref.load %arg0[%c56] : memref<72xf32, #tpu.memory_space<smem>>
    %308 = vector.broadcast %307 : f32 to vector<1x2xf32>
    %309 = arith.mulf %308, %196 : vector<1x2xf32>
    %310 = arith.addf %306, %309 : vector<1x2xf32>
    %c57 = arith.constant 57 : index
    %311 = memref.load %arg0[%c57] : memref<72xf32, #tpu.memory_space<smem>>
    %312 = vector.broadcast %311 : f32 to vector<1x2xf32>
    %313 = arith.mulf %312, %224 : vector<1x2xf32>
    %314 = arith.addf %310, %313 : vector<1x2xf32>
    %c58 = arith.constant 58 : index
    %315 = memref.load %arg0[%c58] : memref<72xf32, #tpu.memory_space<smem>>
    %316 = vector.broadcast %315 : f32 to vector<1x2xf32>
    %317 = arith.mulf %316, %252 : vector<1x2xf32>
    %318 = arith.addf %314, %317 : vector<1x2xf32>
    %c59 = arith.constant 59 : index
    %319 = memref.load %arg0[%c59] : memref<72xf32, #tpu.memory_space<smem>>
    %320 = vector.broadcast %319 : f32 to vector<1x2xf32>
    %321 = arith.mulf %320, %280 : vector<1x2xf32>
    %322 = arith.addf %318, %321 : vector<1x2xf32>
    %c71 = arith.constant 71 : index
    %323 = memref.load %arg0[%c71] : memref<72xf32, #tpu.memory_space<smem>>
    %324 = vector.broadcast %323 : f32 to vector<1x2xf32>
    %c60 = arith.constant 60 : index
    %325 = memref.load %arg0[%c60] : memref<72xf32, #tpu.memory_space<smem>>
    %326 = vector.broadcast %325 : f32 to vector<1x2xf32>
    %327 = arith.mulf %326, %28 : vector<1x2xf32>
    %328 = arith.addf %324, %327 : vector<1x2xf32>
    %c61 = arith.constant 61 : index
    %329 = memref.load %arg0[%c61] : memref<72xf32, #tpu.memory_space<smem>>
    %330 = vector.broadcast %329 : f32 to vector<1x2xf32>
    %331 = arith.mulf %330, %56 : vector<1x2xf32>
    %332 = arith.addf %328, %331 : vector<1x2xf32>
    %c62 = arith.constant 62 : index
    %333 = memref.load %arg0[%c62] : memref<72xf32, #tpu.memory_space<smem>>
    %334 = vector.broadcast %333 : f32 to vector<1x2xf32>
    %335 = arith.mulf %334, %84 : vector<1x2xf32>
    %336 = arith.addf %332, %335 : vector<1x2xf32>
    %c63 = arith.constant 63 : index
    %337 = memref.load %arg0[%c63] : memref<72xf32, #tpu.memory_space<smem>>
    %338 = vector.broadcast %337 : f32 to vector<1x2xf32>
    %339 = arith.mulf %338, %112 : vector<1x2xf32>
    %340 = arith.addf %336, %339 : vector<1x2xf32>
    %c64 = arith.constant 64 : index
    %341 = memref.load %arg0[%c64] : memref<72xf32, #tpu.memory_space<smem>>
    %342 = vector.broadcast %341 : f32 to vector<1x2xf32>
    %343 = arith.mulf %342, %140 : vector<1x2xf32>
    %344 = arith.addf %340, %343 : vector<1x2xf32>
    %c65 = arith.constant 65 : index
    %345 = memref.load %arg0[%c65] : memref<72xf32, #tpu.memory_space<smem>>
    %346 = vector.broadcast %345 : f32 to vector<1x2xf32>
    %347 = arith.mulf %346, %168 : vector<1x2xf32>
    %348 = arith.addf %344, %347 : vector<1x2xf32>
    %c66 = arith.constant 66 : index
    %349 = memref.load %arg0[%c66] : memref<72xf32, #tpu.memory_space<smem>>
    %350 = vector.broadcast %349 : f32 to vector<1x2xf32>
    %351 = arith.mulf %350, %196 : vector<1x2xf32>
    %352 = arith.addf %348, %351 : vector<1x2xf32>
    %c67 = arith.constant 67 : index
    %353 = memref.load %arg0[%c67] : memref<72xf32, #tpu.memory_space<smem>>
    %354 = vector.broadcast %353 : f32 to vector<1x2xf32>
    %355 = arith.mulf %354, %224 : vector<1x2xf32>
    %356 = arith.addf %352, %355 : vector<1x2xf32>
    %c68 = arith.constant 68 : index
    %357 = memref.load %arg0[%c68] : memref<72xf32, #tpu.memory_space<smem>>
    %358 = vector.broadcast %357 : f32 to vector<1x2xf32>
    %359 = arith.mulf %358, %252 : vector<1x2xf32>
    %360 = arith.addf %356, %359 : vector<1x2xf32>
    %c69 = arith.constant 69 : index
    %361 = memref.load %arg0[%c69] : memref<72xf32, #tpu.memory_space<smem>>
    %362 = vector.broadcast %361 : f32 to vector<1x2xf32>
    %363 = arith.mulf %362, %280 : vector<1x2xf32>
    %364 = arith.addf %360, %363 : vector<1x2xf32>
    %cst_21 = arith.constant dense<0xFF800000> : vector<1xf32>
    %365 = vector.multi_reduction <maximumf>, %322, %cst_21 [1] : vector<1x2xf32> to vector<1xf32>
    %366 = vector.shape_cast %365 : vector<1xf32> to vector<1x1xf32>
    %367 = vector.broadcast %366 : vector<1x1xf32> to vector<1x2xf32>
    %368 = arith.subf %322, %367 : vector<1x2xf32>
    %369 = math.exp %368 : vector<1x2xf32>
    %cst_22 = arith.constant dense<0.000000e+00> : vector<1xf32>
    %370 = vector.multi_reduction <add>, %369, %cst_22 [1] : vector<1x2xf32> to vector<1xf32>
    %371 = vector.shape_cast %370 : vector<1xf32> to vector<1x1xf32>
    %372 = tpu.reciprocal %371 {approx = true} : vector<1x1xf32> -> vector<1x1xf32>
    %373 = vector.broadcast %372 : vector<1x1xf32> to vector<1x2xf32>
    %374 = arith.mulf %369, %373 : vector<1x2xf32>
    %cst_23 = arith.constant dense<0xFF800000> : vector<1xf32>
    %375 = vector.multi_reduction <maximumf>, %364, %cst_23 [1] : vector<1x2xf32> to vector<1xf32>
    %376 = vector.shape_cast %375 : vector<1xf32> to vector<1x1xf32>
    %377 = vector.broadcast %376 : vector<1x1xf32> to vector<1x2xf32>
    %378 = arith.subf %364, %377 : vector<1x2xf32>
    %379 = math.exp %378 : vector<1x2xf32>
    %cst_24 = arith.constant dense<0.000000e+00> : vector<1xf32>
    %380 = vector.multi_reduction <add>, %379, %cst_24 [1] : vector<1x2xf32> to vector<1xf32>
    %381 = vector.shape_cast %380 : vector<1xf32> to vector<1x1xf32>
    %382 = tpu.reciprocal %381 {approx = true} : vector<1x1xf32> -> vector<1x1xf32>
    %383 = vector.broadcast %382 : vector<1x1xf32> to vector<1x2xf32>
    %384 = arith.mulf %379, %383 : vector<1x2xf32>
    %c0_25 = arith.constant 0 : index
    %c0_26 = arith.constant 0 : index
    %385 = vector.load %arg2[%c0_25, %c0_26] : memref<4x2xf32, #tpu.memory_space<vmem>>, vector<1x2xf32>
    tpu.vector_store %arg2[%c0_25, %c0_26], %374 {strides = array<i32>} : memref<4x2xf32, #tpu.memory_space<vmem>>, vector<1x2xf32>,
    %c2_27 = arith.constant 2 : index
    %c0_28 = arith.constant 0 : index
    %386 = vector.load %arg2[%c2_27, %c0_28] : memref<4x2xf32, #tpu.memory_space<vmem>>, vector<1x2xf32>
    tpu.vector_store %arg2[%c2_27, %c0_28], %322 {strides = array<i32>} : memref<4x2xf32, #tpu.memory_space<vmem>>, vector<1x2xf32>,
    %c1_29 = arith.constant 1 : index
    %c0_30 = arith.constant 0 : index
    %387 = vector.load %arg2[%c1_29, %c0_30] : memref<4x2xf32, #tpu.memory_space<vmem>>, vector<1x2xf32>
    tpu.vector_store %arg2[%c1_29, %c0_30], %384 {strides = array<i32>} : memref<4x2xf32, #tpu.memory_space<vmem>>, vector<1x2xf32>,
    %c3_31 = arith.constant 3 : index
    %c0_32 = arith.constant 0 : index
    %388 = vector.load %arg2[%c3_31, %c0_32] : memref<4x2xf32, #tpu.memory_space<vmem>>, vector<1x2xf32>
    tpu.vector_store %arg2[%c3_31, %c0_32], %364 {strides = array<i32>} : memref<4x2xf32, #tpu.memory_space<vmem>>, vector<1x2xf32>,
    return
  }
}

</mosaic_0001>

<bundles_post_ra>
// kernel: pg_appx_nn_forward.1
= control target key start
LH: loop header
LB: loop body
LE: loop exit
PB: predicated region body
PF: predicated region fallthrough
CT: control target
= control target key end

     0   :  { %7 = vsyncpa [#allocation3], 0  ;;  %s595_s12 = smov [#allocation2]   ;;  %s870_s0 = inlined_call_operand.vmem [shape: f32[72], index: 0, kind: input, shape index: {}]   ;;  %s871_s1 = inlined_call_operand.vmem [shape: f32[4,2], index: 1, kind: input, shape index: {}]   ;;  %s872_s2 = inlined_call_operand.vmem [shape: f32[4,2], index: 2, kind: output, shape index: {}]  }
   0x1   :  { %s13_s11 = sshll.u32 %s870_s0, 4  ;;  %s14_s11 = int_to_ptr.vmem [resolvable:$true] %s13_s11 }
   0x2   :  { %16 = dma.vmem_to_smem %s14_s11, 16, %s595_s12, [#allocation3]  }
   0x3   :  { %593 = dma.done.wait [#allocation3], 16  }
   0x4   :  { %594 = vsyncadd [#allocation3], 4294967280 }
   0x5   :  { %23 = sfence }
   0x6   :  { %s461_s13 = sld [smem:[#allocation2 + $0x28]]  ;;  %v617_v0 = vld [vmem:[%s871_s1] sm:$0xf]  ;;  %vm429_vm0 = vcmask 8192  }
   0x7   :  { %s27_s14 = sld [smem:[#allocation2]] }
   0x8   :  { %s462_s15 = sld [smem:[#allocation2 + $0x1]] }
   0x9   :  { %s463_s16 = sld [smem:[#allocation2 + $0x2]] }
   0xa   :  { %s464_s17 = sld [smem:[#allocation2 + $0x3]] }
   0xb   :  { %s619_s20 = sld [smem:[#allocation2 + $0x29]] }
   0xc   :  { %s466_s21 = sld [smem:[#allocation2 + $0x4]]  ;;  %v26_v1 = vstv %s461_s13 }
   0xd   :  { %v28_v2 = vstv %s27_s14  ;;  %s467_s0 = sld [smem:[#allocation2 + $0x5]] }
   0xe   :  { %v29_v3 = vmul.f32 %v28_v2, %v617_v0  ;;  %v32_v4 = vstv %s462_s15  ;;  %s468_s22 = sld [smem:[#allocation2 + $0x6]] }
   0xf   :  { %v33_v5 = vmul.f32 %v32_v4, %v617_v0  ;;  %v39_v6 = vstv %s463_s16  ;;  %s469_s23 = sld [smem:[#allocation2 + $0x7]] }
  0x10   :  { %v30_v7 = vadd.f32 %v29_v3, %v26_v1  ;;  %v40_v8 = vmul.f32 %v39_v6, %v617_v0  ;;  %v46_v9 = vstv %s464_s17  ;;  %s624_s1 = sld [smem:[#allocation2 + $0x2a]] }
  0x11   :  { %v35_v10 = vrot.slane %v33_v5, 1  ;;  %v47_v11 = vmul.f32 %v46_v9, %v617_v0  ;;  %s471_s24 = sld [smem:[#allocation2 + $0x8]]  ;;  %v58_v13 = vstv %s619_s20 }
  0x12   :  { %v42_v12 = vrot.slane %v40_v8, 2  ;;  %v60_v14 = vstv %s466_s21  ;;  %s472_s25 = sld [smem:[#allocation2 + $0x9]] }
  0x13   :  { %v37_v15 = vadd.f32 %v35_v10, %v30_v7  ;;  %v49_v16 = vrot.slane %v47_v11, 3  ;;  %v61_v17 = vmul.f32 %v60_v14, %v617_v0  ;;  %v64_v18 = vstv %s467_s0  ;;  %s473_s26 = sld [smem:[#allocation2 + $0xa]] }
  0x14   :  { %v65_v19 = vmul.f32 %v64_v18, %v617_v0  ;;  %v71_v20 = vstv %s468_s22  ;;  %s474_s27 = sld [smem:[#allocation2 + $0xb]] }
  0x15   :  { %v44_v21 = vadd.f32 %v42_v12, %v37_v15  ;;  %v62_v22 = vadd.f32 %v61_v17, %v58_v13  ;;  %v72_v23 = vmul.f32 %v71_v20, %v617_v0  ;;  %v78_v24 = vstv %s469_s23  ;;  %s631_s28 = sld [smem:[#allocation2 + $0x2b]] }
  0x16   :  { %v67_v25 = vrot.slane %v65_v19, 1  ;;  %v79_v26 = vmul.f32 %v78_v24, %v617_v0  ;;  %s634_s29 = sld [smem:[#allocation2 + $0xc]]  ;;  %v90_v29 = vstv %s624_s1 }
  0x17   :  { %v51_v27 = vadd.f32 %v49_v16, %v44_v21  ;;  %v74_v28 = vrot.slane %v72_v23, 2  ;;  %v92_v30 = vstv %s471_s24  ;;  %s637_s30 = sld [smem:[#allocation2 + $0xd]] }
  0x18   :  { %v69_v31 = vadd.f32 %v67_v25, %v62_v22  ;;  %v81_v32 = vrot.slane %v79_v26, 3  ;;  %v93_v33 = vmul.f32 %v92_v30, %v617_v0  ;;  %v96_v34 = vstv %s472_s25  ;;  %s640_s3 = sld [smem:[#allocation2 + $0xe]] }
  0x19   :  { %v52_v35 = vsub.f32 0.0, %v51_v27  ;;  %v97_v36 = vmul.f32 %v96_v34, %v617_v0  ;;  %v103_v37 = vstv %s473_s26  ;;  %s643_s4 = sld [smem:[#allocation2 + $0xf]] }
  0x1a   :  { %v76_v38 = vadd.f32 %v74_v28, %v69_v31  ;;  %v94_v39 = vadd.f32 %v93_v33, %v90_v29  ;;  %v104_v40 = vmul.f32 %v103_v37, %v617_v0  ;;  %v110_v41 = vstv %s474_s27  ;;  %s646_s5 = sld [smem:[#allocation2 + $0x2c]] }
  0x1b   :  { %v53_v42 = vmul.f32 1.442695, %v52_v35  ;;  %v99_v43 = vrot.slane %v97_v36, 1  ;;  %v111_v44 = vmul.f32 %v110_v41, %v617_v0  ;;  %s649_s6 = sld [smem:[#allocation2 + $0x10]]  ;;  %v122_v47 = vstv %s631_s28 }
  0x1c   :  { %v83_v45 = vadd.f32 %v81_v32, %v76_v38  ;;  %v106_v46 = vrot.slane %v104_v40, 2  ;;  %v124_v48 = vstv %s634_s29  ;;  %s653_s7 = sld [smem:[#allocation2 + $0x11]] }
  0x1d   :  { %533 = vpow2.f32 %v53_v42  ;;  %v101_v49 = vadd.f32 %v99_v43, %v94_v39  ;;  %v113_v50 = vrot.slane %v111_v44, 3  ;;  %v125_v51 = vmul.f32 %v124_v48, %v617_v0  ;;  %s656_s8 = sld [smem:[#allocation2 + $0x12]] }
  0x1e   :  { %v84_v52 = vsub.f32 0.0, %v83_v45  ;;  %v128_v53 = vstv %s637_s30  ;;  %v135_v54 = vstv %s640_s3  ;;  %s660_s9 = sld [smem:[#allocation2 + $0x13]] }
  0x1f   :  { %v108_v55 = vadd.f32 %v106_v46, %v101_v49  ;;  %v126_v56 = vadd.f32 %v125_v51, %v122_v47  ;;  %v129_v57 = vmul.f32 %v128_v53, %v617_v0  ;;  %v136_v58 = vmul.f32 %v135_v54, %v617_v0  ;;  %s664_s10 = sld [smem:[#allocation2 + $0x2d]] }
  0x20   :  { %v85_v59 = vmul.f32 1.442695, %v84_v52  ;;  %v142_v60 = vstv %s643_s4  ;;  %s667_s11 = sld [smem:[#allocation2 + $0x14]]  ;;  %v154_v2 = vstv %s646_s5 }
  0x21   :  { %v115_v61 = vadd.f32 %v113_v50, %v108_v55  ;;  %v131_v62 = vrot.slane %v129_v57, 1  ;;  %v138_v63 = vrot.slane %v136_v58, 2  ;;  %v143_v1 = vmul.f32 %v142_v60, %v617_v0  ;;  %s670_s12 = sld [smem:[#allocation2 + $0x15]] }
  0x22   :  { %535 = vpow2.f32 %v85_v59  ;;  %v156_v3 = vstv %s649_s6  ;;  %v160_v4 = vstv %s653_s7  ;;  %s675_s13 = sld [smem:[#allocation2 + $0x16]] }
  0x23   :  { %v534_v5 = vpop.eup %533  ;;  %v116_v6 = vsub.f32 0.0, %v115_v61  ;;  %v133_v7 = vadd.f32 %v131_v62, %v126_v56  ;;  %v145_v8 = vrot.slane %v143_v1, 3  ;;  %v157_v9 = vmul.f32 %v156_v3, %v617_v0  ;;  %s678_s14 = sld [smem:[#allocation2 + $0x17]] }
  0x24   :  { %v55_v10 = vadd.f32 1.0, %v534_v5  ;;  %v161_v11 = vmul.f32 %v160_v4, %v617_v0  ;;  %v167_v12 = vstv %s656_s8  ;;  %v174_v13 = vstv %s660_s9  ;;  %s683_s15 = sld [smem:[#allocation2 + $0x2e]] }
  0x25   :  { %v117_v14 = vmul.f32 1.442695, %v116_v6  ;;  %v140_v15 = vadd.f32 %v138_v63, %v133_v7  ;;  %v158_v16 = vadd.f32 %v157_v9, %v154_v2  ;;  %v168_v17 = vmul.f32 %v167_v12, %v617_v0  ;;  %s686_s16 = sld [smem:[#allocation2 + $0x18]] }
  0x26   :  { %537 = vrcp.f32 %v55_v10  ;;  %v163_v18 = vrot.slane %v161_v11, 1  ;;  %v175_v19 = vmul.f32 %v174_v13, %v617_v0  ;;  %v186_v20 = vstv %s664_s10  ;;  %s690_s17 = sld [smem:[#allocation2 + $0x19]] }
  0x27   :  { %539 = vpow2.f32 %v117_v14  ;;  %v147_v21 = vadd.f32 %v145_v8, %v140_v15  ;;  %v170_v22 = vrot.slane %v168_v17, 2  ;;  %v188_v23 = vstv %s667_s11  ;;  %s693_s18 = sld [smem:[#allocation2 + $0x1a]] }
  0x28   :  { %v536_v24 = vpop.eup %535  ;;  %v165_v25 = vadd.f32 %v163_v18, %v158_v16  ;;  %v177_v26 = vrot.slane %v175_v19, 3  ;;  %v189_v27 = vmul.f32 %v188_v23, %v617_v0  ;;  %v192_v28 = vstv %s670_s12  ;;  %s697_s19 = sld [smem:[#allocation2 + $0x1b]] }
  0x29   :  { %v87_v29 = vadd.f32 1.0, %v536_v24  ;;  %v148_v30 = vsub.f32 0.0, %v147_v21  ;;  %v193_v31 = vmul.f32 %v192_v28, %v617_v0  ;;  %v199_v32 = vstv %s675_s13  ;;  %s701_s20 = sld [smem:[#allocation2 + $0x2f]] }
  0x2a   :  { %v172_v33 = vadd.f32 %v170_v22, %v165_v25  ;;  %v190_v34 = vadd.f32 %v189_v27, %v186_v20  ;;  %v200_v35 = vmul.f32 %v199_v32, %v617_v0  ;;  %v206_v36 = vstv %s678_s14  ;;  %s705_s21 = sld [smem:[#allocation2 + $0x1c]] }
  0x2b   :  { %541 = vrcp.f32 %v87_v29  ;;  %v149_v37 = vmul.f32 1.442695, %v148_v30  ;;  %v195_v38 = vrot.slane %v193_v31, 1  ;;  %v207_v39 = vmul.f32 %v206_v36, %v617_v0  ;;  %s708_s0 = sld [smem:[#allocation2 + $0x1d]] }
  0x2c   :  { %v710_v40 = vpop.eup %537  ;;  %v179_v41 = vadd.f32 %v177_v26, %v172_v33  ;;  %v202_v42 = vrot.slane %v200_v35, 2  ;;  %v218_v43 = vstv %s683_s15  ;;  %v220_v44 = vstv %s686_s16  ;;  %s714_s22 = sld [smem:[#allocation2 + $0x1e]] }
  0x2d   :  { %v540_v45 = vpop.eup %539  ;;  %543 = vpow2.f32 %v149_v37  ;;  %v197_v46 = vadd.f32 %v195_v38, %v190_v34  ;;  %v209_v47 = vrot.slane %v207_v39, 3  ;;  %v221_v48 = vmul.f32 %v220_v44, %v617_v0  ;;  %s717_s23 = sld [smem:[#allocation2 + $0x1f]] }
  0x2e   :  { %v119_v49 = vadd.f32 1.0, %v540_v45  ;;  %v180_v50 = vsub.f32 0.0, %v179_v41  ;;  %v224_v51 = vstv %s690_s17  ;;  %v231_v52 = vstv %s693_s18  ;;  %s721_s1 = sld [smem:[#allocation2 + $0x30]] }
  0x2f   :  { %v204_v53 = vadd.f32 %v202_v42, %v197_v46  ;;  %v222_v54 = vadd.f32 %v221_v48, %v218_v43  ;;  %v225_v55 = vmul.f32 %v224_v51, %v617_v0  ;;  %v232_v56 = vmul.f32 %v231_v52, %v617_v0  ;;  %s725_s24 = sld [smem:[#allocation2 + $0x20]] }
  0x30   :  { %545 = vrcp.f32 %v119_v49  ;;  %v181_v57 = vmul.f32 1.442695, %v180_v50  ;;  %v238_v58 = vstv %s697_s19  ;;  %v250_v59 = vstv %s701_s20  ;;  %s729_s25 = sld [smem:[#allocation2 + $0x21]] }
  0x31   :  { %v731_v60 = vpop.eup %541  ;;  %v211_v61 = vadd.f32 %v209_v47, %v204_v53  ;;  %v227_v62 = vrot.slane %v225_v55, 1  ;;  %v234_v63 = vrot.slane %v232_v56, 2  ;;  %v239_v1 = vmul.f32 %v238_v58, %v617_v0  ;;  %s734_s26 = sld [smem:[#allocation2 + $0x22]] }
  0x32   :  { %547 = vpow2.f32 %v181_v57  ;;  %v252_v2 = vstv %s705_s21  ;;  %v256_v3 = vstv %s708_s0  ;;  %v263_v4 = vstv %s714_s22  ;;  %s739_s27 = sld [smem:[#allocation2 + $0x23]] }
  0x33   :  { %v544_v5 = vpop.eup %543  ;;  %v212_v6 = vsub.f32 0.0, %v211_v61  ;;  %v229_v7 = vadd.f32 %v227_v62, %v222_v54  ;;  %v241_v8 = vrot.slane %v239_v1, 3  ;;  %v253_v9 = vmul.f32 %v252_v2, %v617_v0  ;;  %s742_s28 = sld [smem:[#allocation2 + $0x31]] }
  0x34   :  { %v151_v10 = vadd.f32 1.0, %v544_v5  ;;  %v257_v11 = vmul.f32 %v256_v3, %v617_v0  ;;  %v264_v12 = vmul.f32 %v263_v4, %v617_v0  ;;  %v270_v13 = vstv %s717_s23  ;;  %s747_s29 = sld [smem:[#allocation2 + $0x24]] }
  0x35   :  { %v213_v14 = vmul.f32 1.442695, %v212_v6  ;;  %v236_v15 = vadd.f32 %v234_v63, %v229_v7  ;;  %v254_v16 = vadd.f32 %v253_v9, %v250_v59  ;;  %v271_v17 = vmul.f32 %v270_v13, %v617_v0  ;;  %s750_s30 = sld [smem:[#allocation2 + $0x25]] }
  0x36   :  { %v752_v18 = vpop.eup %545  ;;  %549 = vrcp.f32 %v151_v10  ;;  %v259_v19 = vrot.slane %v257_v11, 1  ;;  %v266_v20 = vrot.slane %v264_v12, 2  ;;  %v282_v21 = vstv %s721_s1  ;;  %s755_s3 = sld [smem:[#allocation2 + $0x26]] }
  0x37   :  { %551 = vpow2.f32 %v213_v14  ;;  %v243_v22 = vadd.f32 %v241_v8, %v236_v15  ;;  %v273_v23 = vrot.slane %v271_v17, 3  ;;  %v284_v24 = vstv %s725_s24  ;;  %s758_s4 = sld [smem:[#allocation2 + $0x27]] }
  0x38   :  { %v548_v25 = vpop.eup %547  ;;  %v261_v26 = vadd.f32 %v259_v19, %v254_v16  ;;  %v285_v27 = vmul.f32 %v284_v24, %v617_v0  ;;  %v288_v28 = vstv %s729_s25  ;;  %v295_v29 = vstv %s734_s26  ;;  %s763_s5 = sld [smem:[#allocation2 + $0x46]] }
  0x39   :  { %v183_v30 = vadd.f32 1.0, %v548_v25  ;;  %v244_v31 = vsub.f32 0.0, %v243_v22  ;;  %v289_v32 = vmul.f32 %v288_v28, %v617_v0  ;;  %v296_v33 = vmul.f32 %v295_v29, %v617_v0  ;;  %s767_s6 = sld [smem:[#allocation2 + $0x32]] }
  0x3a   :  { %v268_v34 = vadd.f32 %v266_v20, %v261_v26  ;;  %v286_v35 = vadd.f32 %v285_v27, %v282_v21  ;;  %v302_v36 = vstv %s739_s27  ;;  %v314_v37 = vstv %s742_s28  ;;  %s771_s7 = sld [smem:[#allocation2 + $0x33]] }
  0x3b   :  { %553 = vrcp.f32 %v183_v30  ;;  %v245_v38 = vmul.f32 1.442695, %v244_v31  ;;  %v291_v39 = vrot.slane %v289_v32, 1  ;;  %v298_v41 = vrot.slane %v296_v33, 2  ;;  %s773_s8 = sld [smem:[#allocation2 + $0x34]] }
  0x3c   :  { %v775_v42 = vpop.eup %549  ;;  %v275_v43 = vadd.f32 %v273_v23, %v268_v34  ;;  %v303_v44 = vmul.f32 %v302_v36, %v617_v0  ;;  %v316_v45 = vstv %s747_s29  ;;  %v320_v46 = vstv %s750_s30  ;;  %s780_s9 = sld [smem:[#allocation2 + $0x35]] }
  0x3d   :  { %v552_v47 = vpop.eup %551  ;;  %555 = vpow2.f32 %v245_v38  ;;  %v293_v48 = vadd.f32 %v291_v39, %v286_v35  ;;  %v317_v49 = vmul.f32 %v316_v45, %v617_v0  ;;  %v321_v50 = vmul.f32 %v320_v46, %v617_v0  ;;  %s785_s10 = sld [smem:[#allocation2 + $0x36]] }
  0x3e   :  { %v215_v51 = vadd.f32 1.0, %v552_v47  ;;  %v276_v52 = vsub.f32 0.0, %v275_v43  ;;  %v305_v53 = vrot.slane %v303_v44, 3  ;;  %v327_v54 = vstv %s755_s3  ;;  %s788_s11 = sld [smem:[#allocation2 + $0x37]] }
  0x3f   :  { %v300_v55 = vadd.f32 %v298_v41, %v293_v48  ;;  %v318_v56 = vadd.f32 %v317_v49, %v314_v37  ;;  %v323_v57 = vrot.slane %v321_v50, 1  ;;  %v328_v58 = vmul.f32 %v327_v54, %v617_v0  ;;  %s795_s12 = sld [smem:[#allocation2 + $0x38]] }
  0x40   :  { %557 = vrcp.f32 %v215_v51  ;;  %v277_v59 = vmul.f32 1.442695, %v276_v52  ;;  %v334_v61 = vstv %s758_s4  ;;  %v346_v62 = vstv %s763_s5  ;;  %s800_s13 = sld [smem:[#allocation2 + $0x39]] }
  0x41   :  { %v792_v63 = vpop.eup %553  ;;  %v307_v1 = vadd.f32 %v305_v53, %v300_v55  ;;  %v325_v2 = vadd.f32 %v323_v57, %v318_v56  ;;  %v330_v3 = vrot.slane %v328_v58, 2  ;;  %v335_v4 = vmul.f32 %v334_v61, %v617_v0  ;;  %s803_s14 = sld [smem:[#allocation2 + $0x47]] }
  0x42   :  { %559 = vpow2.f32 %v277_v59  ;;  %v348_v5 = vstv %s767_s6  ;;  %v352_v6 = vstv %s771_s7  ;;  %v356_v7 = vstv %s773_s8  ;;  %s807_s15 = sld [smem:[#allocation2 + $0x3c]] }
  0x43   :  { %v556_v8 = vpop.eup %555  ;;  %v308_v9 = vsub.f32 0.0, %v307_v1  ;;  %v332_v10 = vadd.f32 %v330_v3, %v325_v2  ;;  %v337_v11 = vrot.slane %v335_v4, 3  ;;  %v349_v12 = vmul.f32 %v710_v40, %v348_v5  ;;  %s523_s16 = sld [smem:[#allocation2 + $0x3d]] }
  0x44   :  { %v247_v13 = vadd.f32 1.0, %v556_v8  ;;  %v353_v0 = vmul.f32 %v731_v60, %v352_v6  ;;  %v360_v14 = vstv %s780_s9  ;;  %v357_v19 = vmul.f32 %v752_v18, %v356_v7  ;;  %s812_s17 = sld [smem:[#allocation2 + $0x3e]] }
  0x45   :  { %v309_v15 = vmul.f32 1.442695, %v308_v9  ;;  %v339_v16 = vadd.f32 %v337_v11, %v332_v10  ;;  %v350_v17 = vadd.f32 %v349_v12, %v346_v62  ;;  %v361_v21 = vmul.f32 %v775_v42, %v360_v14  ;;  %s815_s18 = sld [smem:[#allocation2 + $0x3f]] }
  0x46   :  { %v558_v20 = vpop.eup %557  ;;  %561 = vrcp.f32 %v247_v13  ;;  %v364_v22 = vstv %s785_s10  ;;  %v368_v25 = vstv %s788_s11  ;;  %s817_s19 = sld [smem:[#allocation2 + $0x40]]  ;;  %v372_v32 = vstv %s795_s12 }
  0x47   :  { %563 = vpow2.f32 %v309_v15  ;;  %v340_v23 = vsub.f32 0.0, %v339_v16  ;;  %v354_v24 = vadd.f32 %v353_v0, %v350_v17  ;;  %v365_v30 = vmul.f32 %v792_v63, %v364_v22  ;;  %s820_s20 = sld [smem:[#allocation2 + $0x41]] }
  0x48   :  { %v560_v26 = vpop.eup %559  ;;  %v369_v31 = vmul.f32 %v558_v20, %v368_v25  ;;  %v388_v33 = vstv %s803_s14  ;;  %v390_v34 = vstv %s807_s15  ;;  %s825_s21 = sld [smem:[#allocation2 + $0x42]]  ;;  %v376_v51 = vstv %s800_s13 }
  0x49   :  { %v279_v27 = vadd.f32 1.0, %v560_v26  ;;  %v341_v28 = vmul.f32 1.442695, %v340_v23  ;;  %v358_v29 = vadd.f32 %v357_v19, %v354_v24  ;;  %s827_s0 = sld [smem:[#allocation2 + $0x3a]]  ;;  %v391_v36 = vmul.f32 %v710_v40, %v390_v34 }
  0x4a   :  { %v394_v37 = vstv %s523_s16  ;;  %v398_v41 = vstv %s812_s17  ;;  %s832_s22 = sld [smem:[#allocation2 + $0x43]] }
  0x4b   :  { %565 = vrcp.f32 %v279_v27  ;;  %v362_v35 = vadd.f32 %v361_v21, %v358_v29  ;;  %v395_v39 = vmul.f32 %v731_v60, %v394_v37  ;;  %v392_v45 = vadd.f32 %v391_v36, %v388_v33  ;;  %s837_s23 = sld [smem:[#allocation2 + $0x44]] }
  0x4c   :  { %v562_v38 = vpop.eup %561  ;;  %567 = vpow2.f32 %v341_v28  ;;  %v399_v46 = vmul.f32 %v752_v18, %v398_v41  ;;  %v402_v49 = vstv %s815_s18  ;;  %v406_v50 = vstv %s817_s19  ;;  %s841_s1 = sld [smem:[#allocation2 + $0x3b]] }
  0x4d   :  { %v564_v43 = vpop.eup %563  ;;  %v366_v44 = vadd.f32 %v365_v30, %v362_v35  ;;  %v373_v48 = vmul.f32 %v562_v38, %v372_v32  ;;  %v396_v52 = vadd.f32 %v395_v39, %v392_v45  ;;  %v403_v60 = vmul.f32 %v775_v42, %v402_v49  ;;  %s531_s24 = sld [smem:[#allocation2 + $0x45]] }
  0x4e   :  { %v311_v47 = vadd.f32 1.0, %v564_v43  ;;  %v410_v53 = vstv %s820_s20  ;;  %v407_v55 = vmul.f32 %v792_v63, %v406_v50  ;;  %v414_v59 = vstv %s825_s21 }
  0x4f   :  { %v370_v40 = vadd.f32 %v369_v31, %v366_v44  ;;  %v400_v18 = vadd.f32 %v399_v46, %v396_v52  ;;  %v411_v1 = vmul.f32 %v558_v20, %v410_v53  ;;  %v380_v42 = vstv %s827_s0 }
  0x50   :  { %569 = vrcp.f32 %v311_v47  ;;  %v418_v2 = vstv %s832_s22  ;;  %v415_v4 = vmul.f32 %v562_v38, %v414_v59 }
  0x51   :  { %v566_v54 = vpop.eup %565  ;;  %v374_v57 = vadd.f32 %v373_v48, %v370_v40  ;;  %v404_v62 = vadd.f32 %v403_v60, %v400_v18  ;;  %v422_v7 = vstv %s837_s23 }
  0x52   :  { %v568_v56 = vpop.eup %567  ;;  %v377_v58 = vmul.f32 %v566_v54, %v376_v51  ;;  %v419_v9 = vmul.f32 %v566_v54, %v418_v2  ;;  %v384_v10 = vstv %s841_s1 }
  0x53   :  { %v343_v61 = vadd.f32 1.0, %v568_v56  ;;  %v408_v3 = vadd.f32 %v407_v55, %v404_v62  ;;  %v426_v13 = vstv %s531_s24 }
  0x54   :  { %v378_v6 = vadd.f32 %v377_v58, %v374_v57 }
  0x55   :  { %571 = vrcp.f32 %v343_v61  ;;  %v412_v63 = vadd.f32 %v411_v1, %v408_v3 }
  0x56   :  { %v570_v5 = vpop.eup %569 }
  0x57   :  { %v381_v8 = vmul.f32 %v570_v5, %v380_v42  ;;  %v416_v11 = vadd.f32 %v415_v4, %v412_v63  ;;  %v423_v12 = vmul.f32 %v570_v5, %v422_v7 }
  0x59   :  { %v382_v0 = vadd.f32 %v381_v8, %v378_v6  ;;  %v420_v15 = vadd.f32 %v419_v9, %v416_v11 }
  0x5b   :  { %v572_v14 = vpop.eup %571  ;;  %v424_v19 = vadd.f32 %v423_v12, %v420_v15 }
  0x5c   :  { %v385_v16 = vmul.f32 %v572_v14, %v384_v10  ;;  %v427_v17 = vmul.f32 %v572_v14, %v426_v13 }
  0x5e   :  { %v386_v20 = vadd.f32 %v385_v16, %v382_v0  ;;  %v428_v21 = vadd.f32 %v427_v17, %v424_v19 }
  0x60   :  { %v430_v22 = vsel %vm429_vm0, %v386_v20, -inf  ;;  %453 = vst.msk [vmem:[%s872_s2 + $0x2] sm:$0x1] %vm429_vm0, %v386_v20  ;;  %v441_v23 = vsel %vm429_vm0, %v428_v21, -inf }
  0x61   :  { %431 = vmax.xlane.f32.xlu0 %v430_v22  ;;  %455 = vst.msk [vmem:[%s872_s2 + $0x3] sm:$0x1] %vm429_vm0, %v428_v21 }
  0x69   :  { %442 = vmax.xlane.f32.xlu0 %v441_v23 }
  0xd4   :  { %v432_v24 = vpop.xlane.xlu0 %431 }
  0xd5   :  { %v433_v25 = vsub.f32 %v386_v20, %v432_v24 }
  0xd7   :  { %v434_v26 = vmul.f32 1.442695, %v433_v25 }
  0xd9   :  { %573 = vpow2.f32 %v434_v26 }
  0xdc   :  { %v443_v27 = vpop.xlane.xlu0 %442 }
  0xdd   :  { %v444_v28 = vsub.f32 %v428_v21, %v443_v27 }
  0xdf   :  { %v574_v29 = vpop.eup %573  ;;  %v445_v30 = vmul.f32 1.442695, %v444_v28 }
  0xe0   :  { %v436_v31 = vsel %vm429_vm0, %v574_v29, 0.0 }
  0xe1   :  { %575 = vpow2.f32 %v445_v30  ;;  %437 = vadd.xlane.f32.xlu1 %v436_v31 }
  0xe7   :  { %v576_v32 = vpop.eup %575 }
  0xe8   :  { %v447_v33 = vsel %vm429_vm0, %v576_v32, 0.0 }
  0xe9   :  { %448 = vadd.xlane.f32.xlu1 %v447_v33 }
 0x154   :  { %v438_v34 = vpop.xlane.xlu1 %437 }
 0x155   :  { %577 = vrcp.f32 %v438_v34 }
 0x15b   :  { %v578_v35 = vpop.eup %577 }
 0x15c   :  { %v440_v36 = vmul.f32 %v578_v35, %v574_v29  ;;  %v449_v37 = vpop.xlane.xlu1 %448 }
 0x15d   :  { %579 = vrcp.f32 %v449_v37 }
 0x15e   :  { %452 = vst.msk [vmem:[%s872_s2] sm:$0x1] %vm429_vm0, %v440_v36 }
 0x163   :  { %v580_v38 = vpop.eup %579 }
 0x164   :  { %v451_v39 = vmul.f32 %v580_v38, %v576_v32 }
 0x166   :  { %454 = vst.msk [vmem:[%s872_s2 + $0x1] sm:$0x1] %vm429_vm0, %v451_v39 }
 0x167   :  { %460 = vsyncpa [#allocation3], 1 }

</bundles_post_ra>
